<compile_context>
chip_gen: v7x
topology: tpu7x:2x2x1
jax: 0.10.0
libtpu: 0.0.40
codegen_flags: <defaults>
</compile_context>

<pallas_src>
import functools

import jax
import jax.numpy as jnp
from jax.experimental import pallas as pl
from jax.experimental.pallas import tpu as pltpu


def _round_up(v, m):
    return (v + m - 1) // m * m


def _pick_batch_tile(B, block_b):
    """Divisor of B, at most block_b, preferring >=2 grid slices (v7x megacore)."""
    tb = max(1, min(block_b, B))
    while B % tb:
        tb -= 1
    if B >= 2 and B // tb < 2:
        tb = max(1, B // 2)
        while B % tb:
            tb -= 1
    return tb


def _biaffine_kernel(x_ref, w_ref, y_ref, o_ref, *, n_out):
    # x_ref: (TB, Lxp, D1p)   w_ref: (n_out, D1p, D2p)   y_ref: (TB, Lyp, D2p)
    # o_ref: (TB, n_out, Lxp, Lyp) float32
    tb, lxp, d1p = x_ref.shape
    d2p = w_ref.shape[2]

    # Flatten batch into the MXU M dimension. Lxp is a multiple of 8, so this
    # reshape is sublane-aligned (no relayout).
    x2 = x_ref[...].reshape(tb * lxp, d1p)
    y = y_ref[...]

    for o in range(n_out):  # n_out is a compile-time constant -> fully unrolled
        # (TB*Lxp, D1p) @ (D1p, D2p) -> (TB*Lxp, D2p), f32 accumulation on the MXU.
        xw = jax.lax.dot_general(
            x2, w_ref[o],
            dimension_numbers=(((1,), (0,)), ((), ())),
            preferred_element_type=jnp.float32)
        xw = xw.astype(y.dtype).reshape(tb, lxp, d2p)

        # s[b] = xw[b] @ y[b]^T  via contraction on the last dims (batch dim 0);
        # no explicit transpose of Y, the MXU consumes it in stored layout.
        s = jax.lax.dot_general(
            xw, y,
            dimension_numbers=(((2,), (2,)), ((0,), (0,))),
            preferred_element_type=jnp.float32)            # (TB, Lxp, Lyp) f32

        o_ref[:, o, :, :] = s.astype(o_ref.dtype)


def biaffine_forward(x, y, weight, *, n_in, n_out=1, scale=0,
                     bias_x=True, bias_y=True,
                     compute_dtype=jnp.bfloat16, block_b=8):
    """Pallas implementation of Biaffine.forward."""
    B, Lx, _ = x.shape
    _, Ly, _ = y.shape
    D1 = n_in + int(bias_x)
    D2 = n_in + int(bias_y)
    assert weight.shape == (n_out, D1, D2), weight.shape

    # Lane/sublane-aligned padded sizes.
    D1p = _round_up(D1, 128)
    D2p = _round_up(D2, 128)
    Lxp = _round_up(Lx, 8)      # sublane-aligned (also keeps the in-kernel reshape free)
    Lyp = _round_up(Ly, 128)    # lane-dense output stores

    # Fold the 1 / n_in**scale normalization into the tiny weight tensor once.
    w = weight.astype(jnp.float32)
    if scale != 0:
        w = w / (float(n_in) ** float(scale))

    # Bias-augmented, zero-padded operands (zeros in the padding keep the math exact).
    x_p = jnp.zeros((B, Lxp, D1p), compute_dtype)
    x_p = x_p.at[:, :Lx, :n_in].set(x.astype(compute_dtype))
    if bias_x:
        x_p = x_p.at[:, :Lx, n_in].set(jnp.asarray(1.0, compute_dtype))

    y_p = jnp.zeros((B, Lyp, D2p), compute_dtype)
    y_p = y_p.at[:, :Ly, :n_in].set(y.astype(compute_dtype))
    if bias_y:
        y_p = y_p.at[:, :Ly, n_in].set(jnp.asarray(1.0, compute_dtype))

    w_p = jnp.zeros((n_out, D1p, D2p), compute_dtype)
    w_p = w_p.at[:, :D1, :D2].set(w.astype(compute_dtype))

    tb = _pick_batch_tile(B, block_b)
    nb = B // tb

    kernel = functools.partial(_biaffine_kernel, n_out=n_out)

    s = pl.pallas_call(
        kernel,
        out_shape=jax.ShapeDtypeStruct((B, n_out, Lxp, Lyp), jnp.float32),
        grid_spec=pltpu.PrefetchScalarGridSpec(
            num_scalar_prefetch=0,
            grid=(nb,),
            in_specs=[
                pl.BlockSpec((tb, Lxp, D1p), lambda b: (b, 0, 0)),
                # Whole weight tensor, constant block index -> DMA'd once, stays resident.
                pl.BlockSpec((n_out, D1p, D2p), lambda b: (0, 0, 0)),
                pl.BlockSpec((tb, Lyp, D2p), lambda b: (b, 0, 0)),
            ],
            out_specs=pl.BlockSpec((tb, n_out, Lxp, Lyp), lambda b: (b, 0, 0, 0)),
        ),
        compiler_params=pltpu.CompilerParams(
            dimension_semantics=("parallel",)),
    )(x_p, w_p, y_p)

    # Drop padding, then torch .squeeze(1) semantics.
    s = s[:, :, :Lx, :Ly]
    if n_out == 1:
        s = s[:, 0]
    return s


def biaffine_reference(x, y, weight, *, n_in, scale=0, bias_x=True, bias_y=True):
    if bias_x:
        x = jnp.concatenate([x, jnp.ones_like(x[..., :1])], axis=-1)
    if bias_y:
        y = jnp.concatenate([y, jnp.ones_like(y[..., :1])], axis=-1)
    s = jnp.einsum('bxi,oij,byj->boxy', x, weight, y) / float(n_in) ** float(scale)
    if s.shape[1] == 1:
        s = s[:, 0]
    return s


if __name__ == "__main__":
    # Small shapes consistent with the module: batch=2, seq=8, n_in=32, n_out=1.
    B, L, n_in, n_out = 2, 8, 32, 1
    bias_x, bias_y, scale = True, True, 0

    key = jax.random.PRNGKey(0)
    kx, ky, kw = jax.random.split(key, 3)
    x = jax.random.normal(kx, (B, L, n_in), dtype=jnp.float32)
    y = jax.random.normal(ky, (B, L, n_in), dtype=jnp.float32)
    # NOTE: reset_parameters() zero-inits the weight (forward would be trivially zero);
    # use a deterministic random init so the compute path is actually exercised.
    weight = 0.02 * jax.random.normal(
        kw, (n_out, n_in + int(bias_x), n_in + int(bias_y)), dtype=jnp.float32)

    ref = biaffine_reference(x, y, weight, n_in=n_in, scale=scale,
                             bias_x=bias_x, bias_y=bias_y)

    # 1) f32 compute path: tight check against the einsum reference.
    out_f32 = biaffine_forward(x, y, weight, n_in=n_in, n_out=n_out, scale=scale,
                               bias_x=bias_x, bias_y=bias_y,
                               compute_dtype=jnp.float32)
    out_f32 = jax.block_until_ready(out_f32)
    assert out_f32.shape == (B, L, L), out_f32.shape
    assert jnp.allclose(out_f32, ref, atol=1e-4, rtol=1e-4), "f32 mismatch vs reference"

    # 2) default bf16-input / f32-accumulate path (MXU-friendly): looser tolerance.
    out_bf16 = biaffine_forward(x, y, weight, n_in=n_in, n_out=n_out, scale=scale,
                                bias_x=bias_x, bias_y=bias_y)
    out_bf16 = jax.block_until_ready(out_bf16)
    assert out_bf16.shape == (B, L, L), out_bf16.shape
    assert jnp.allclose(out_bf16, ref, atol=3e-2, rtol=3e-2), "bf16 mismatch vs reference"

    print("KERNEL_OK")
</pallas_src>

<mosaic_0001>
module attributes {stable_mosaic.version = 11 : i64} {
  func.func @_biaffine_kernel(%arg0: i32, %arg1: memref<1x8x128xf32, #tpu.memory_space<vmem>>, %arg2: memref<1x128x128xf32, #tpu.memory_space<vmem>>, %arg3: memref<1x128x128xf32, #tpu.memory_space<vmem>>, %arg4: memref<1x1x8x128xf32, #tpu.memory_space<vmem>>) attributes {dimension_semantics = [#tpu.dimension_semantics<parallel>], iteration_bounds = array<i64: 2>, scalar_prefetch = 0 : i64, scratch_operands = 0 : i64, tpu.core_type = #tpu.core_type<tc>, window_params = [{transform_indices = @transform_0, window_bounds = array<i64: 1, 8, 128>}, {pipeline_mode = #tpu.pipeline_mode<synchronous>, transform_indices = @transform_1, window_bounds = array<i64: 1, 128, 128>}, {transform_indices = @transform_2, window_bounds = array<i64: 1, 128, 128>}, {transform_indices = @transform_3, window_bounds = array<i64: 1, 1, 8, 128>}]} {
    %c0 = arith.constant 0 : index
    %c0_0 = arith.constant 0 : index
    %c0_1 = arith.constant 0 : index
    %0 = vector.load %arg1[%c0, %c0_0, %c0_1] : memref<1x8x128xf32, #tpu.memory_space<vmem>>, vector<1x8x128xf32>
    %1 = vector.shape_cast %0 : vector<1x8x128xf32> to vector<8x128xf32>
    %c0_2 = arith.constant 0 : index
    %c0_3 = arith.constant 0 : index
    %c0_4 = arith.constant 0 : index
    %2 = vector.load %arg3[%c0_2, %c0_3, %c0_4] : memref<1x128x128xf32, #tpu.memory_space<vmem>>, vector<1x128x128xf32>
    %c0_5 = arith.constant 0 : index
    %c0_6 = arith.constant 0 : index
    %c0_7 = arith.constant 0 : index
    %3 = vector.load %arg2[%c0_5, %c0_6, %c0_7] : memref<1x128x128xf32, #tpu.memory_space<vmem>>, vector<1x128x128xf32>
    %4 = vector.shape_cast %3 : vector<1x128x128xf32> to vector<128x128xf32>
    %cst = arith.constant dense<0.000000e+00> : vector<8x128xf32>
    %5 = tpu.matmul %1, %4, %cst {dimension_numbers = #tpu.dot_dimension_numbers<[1], [0], [0], [1], [0, 0, 1, 1], [], []>} : vector<8x128xf32>, vector<128x128xf32>, vector<8x128xf32> -> vector<8x128xf32>
    %6 = vector.shape_cast %5 : vector<8x128xf32> to vector<1x8x128xf32>
    %cst_8 = arith.constant dense<0.000000e+00> : vector<1x8x128xf32>
    %7 = tpu.matmul %6, %2, %cst_8 {dimension_numbers = #tpu.dot_dimension_numbers<[2], [2], [1], [1], [0, 0, 0, 1, 1, 1], [0], [0]>} : vector<1x8x128xf32>, vector<1x128x128xf32>, vector<1x8x128xf32> -> vector<1x8x128xf32>
    %c0_9 = arith.constant 0 : index
    %c0_10 = arith.constant 0 : index
    %c0_11 = arith.constant 0 : index
    %c0_12 = arith.constant 0 : index
    %8 = vector.load %arg4[%c0_9, %c0_10, %c0_11, %c0_12] : memref<1x1x8x128xf32, #tpu.memory_space<vmem>>, vector<1x1x8x128xf32>
    %9 = vector.shape_cast %8 : vector<1x1x8x128xf32> to vector<1x8x128xf32>
    %10 = vector.shape_cast %7 : vector<1x8x128xf32> to vector<1x1x8x128xf32>
    tpu.vector_store %arg4[%c0_9, %c0_10, %c0_11, %c0_12], %10 {strides = array<i32>} : memref<1x1x8x128xf32, #tpu.memory_space<vmem>>, vector<1x1x8x128xf32>,
    return
  }
  func.func @transform_0(%arg0: i32) -> (i32, i32, i32) {
    %c0_i32 = arith.constant 0 : i32
    %c0_i32_0 = arith.constant 0 : i32
    %c0_i32_1 = arith.constant 0 : i32
    return %arg0, %c0_i32, %c0_i32_0 : i32, i32, i32
  }
  func.func @transform_1(%arg0: i32) -> (i32, i32, i32) {
    %c0_i32 = arith.constant 0 : i32
    %c0_i32_0 = arith.constant 0 : i32
    %c0_i32_1 = arith.constant 0 : i32
    %c0_i32_2 = arith.constant 0 : i32
    return %c0_i32, %c0_i32_0, %c0_i32_1 : i32, i32, i32
  }
  func.func @transform_2(%arg0: i32) -> (i32, i32, i32) {
    %c0_i32 = arith.constant 0 : i32
    %c0_i32_0 = arith.constant 0 : i32
    %c0_i32_1 = arith.constant 0 : i32
    return %arg0, %c0_i32, %c0_i32_0 : i32, i32, i32
  }
  func.func @transform_3(%arg0: i32) -> (i32, i32, i32, i32) {
    %c0_i32 = arith.constant 0 : i32
    %c0_i32_0 = arith.constant 0 : i32
    %c0_i32_1 = arith.constant 0 : i32
    %c0_i32_2 = arith.constant 0 : i32
    return %arg0, %c0_i32, %c0_i32_0, %c0_i32_1 : i32, i32, i32, i32
  }
}

</mosaic_0001>

<bundles_post_ra>
// kernel: tpu_custom_call.1
= control target key start
LH: loop header
LB: loop body
LE: loop exit
PB: predicated region body
PF: predicated region fallthrough
CT: control target
= control target key end

     0   :  { %8 = vsyncpa [#allocation3], 0  ;;  %s1242_s0 = inlined_call_operand.hbm [shape: f32[2,8,128], index: 0, kind: input, shape index: {}]   ;;  %s1243_s1 = inlined_call_operand.hbm [shape: f32[1,128,128], index: 1, kind: input, shape index: {}]   ;;  %s1244_s2 = inlined_call_operand.hbm [shape: f32[2,128,128], index: 2, kind: input, shape index: {}]   ;;  %s1245_s3 = inlined_call_operand.hbm [shape: f32[2,1,8,128], index: 3, kind: output, shape index: {}]  }
   0x1   :  { %10 = vsyncpa [#allocation3 + $0x1], 0 }
   0x2   :  { %11 = vsyncpa [#allocation6], 0 }
   0x3   :  { %12 = vsyncpa [#allocation4], 0 }
   0x4   :  { %14 = vsyncpa [#allocation4 + $0x1], 0  ;;  %s957_s12 = smov 0   ;;  %s959_s13 = smov 0  }
   0x5   :  { %s961_s14 = smov 0   ;;  %s963_s15 = smov 0  }
   0x6 LB: > { %s978_s16 = sadd.s32 1, %s926_s15   ;;  %s27_s17 = sadd.s32 1, %s922_s14  ;;  %s926_s15 = sphi %s963_s15, %s1266_s15   ;;  %s922_s14 = sphi %s961_s14, %s1265_s14   ;;  %s918_s13 = sphi %s959_s13, %s1264_s13   ;;  %s914_s12 = sphi %s957_s12, %s1263_s12  }
   0x7   : > { %s24_s18 = ssub.s32 %s926_s15, %s978_s16  ;;  %p34_p0 = scmp.ne.s32.totalorder %s922_s14, %s918_s13 }
   0x8   : > { %p25_p1 = scmp.eq.s32.totalorder %s24_s18, 0  ;;  %p35_p2 = scmp.eq.s32.totalorder %s926_s15, 0 }
   0x9   : > { %p723_p4 = scmp.lt.s32.totalorder %s926_s15, 2  ;;  %s150_s20 = sand.u32 1, %s926_s15  }
   0xa   : > { %s989_s19 = scalar_select %p25_p1, %s922_s14, %s27_s17  }
   0xb   : > { %p36_p5 = por %p35_p2, %p34_p0  ;;  %s152_s21 = sand.u32 1, %s922_s14  }
   0xc   : > { %s530_s22 = sshll.u32 %s152_s21, 3  ;;  %s531_s23 = sshll.u32 %s926_s15, 7 }
   0xd   : > { %s1000_s26 = scalar_lea.hbm %s1242_s0, %s531_s23  ;;  %s154_s27 = scalar_lea.vmem [#allocation2], %s530_s22 }
   0xe   : > { %s161_s28 = sshll.u32 %s154_s27, 4  ;;  %p1002_p6 = pnand %p723_p4, %p36_p5  ;;  %s1006_s28 = int_to_ptr.vmem [resolvable:$true] %s161_s28 }
   0xf   : > { %s1008_s30 = sshll.u32 %s152_s21, 7  ;;  %s1010_s4 = scalar_lea.sflag [#allocation3], %s150_s20 }
  0x10   : > { %s764_s5 = scalar_lea.hbm %s1000_s26, 128  ;;  %p766_p8 = pneg %p1002_p6 }
  0x11   : > { %p765_p7 = scmp.ne.s32.totalorder %s1000_s26, %s764_s5  ;;  %s769_s8 = scalar_lea.hbm %s1242_s0, 256 }
  0x12   : > { %p770_p11 = scmp.lt.u32.totalorder %s1000_s26, %s1242_s0  ;;  %p771_p12 = scmp.lt.u32.totalorder %s769_s8, %s764_s5 }
  0x13   : > { %p767_p9 = pnand %p766_p8, %p765_p7  ;;  %p773_p1 = scmp.lt.u32.totalorder %s764_s5, %s1000_s26 }
  0x14   : > { %p772_p13 = por %p771_p12, %p770_p11 }
  0x15   : > { %p768_p10 = pneg %p767_p9 }
  0x16   : > { %p774_p2 = por %p773_p1, %p772_p13 }
  0x18   : > { %p775_p4 = pnand %p774_p2, %p768_p10 }
  0x1a   : > { %778 = shalt.err (!%p775_p4)
}
  0x1b   : > { %s779_s11 = scalar_lea.vmem %s1006_s28, 128  ;;  %s928_s17 = smov [#allocation2]  }
  0x1c   : > { %p780_p5 = scmp.ne.s32.totalorder %s1006_s28, %s779_s11  ;;  %s784_s18 = sshll.u32 %s928_s17, 4  ;;  %s785_s18 = int_to_ptr.vmem [resolvable:$false] %s784_s18 }
  0x1d   : > { %s786_s20 = scalar_lea.vmem %s785_s18, 256  ;;  %p787_p3 = scmp.lt.s32.totalorder %s1006_s28, %s785_s18 }
  0x1e   : > { %p782_p7 = pnand %p780_p5, %p766_p8  ;;  %p788_p11 = scmp.lt.s32.totalorder %s786_s20, %s779_s11 }
  0x20   : > { %p783_p9 = pneg %p782_p7  ;;  %p789_p12 = por %p788_p11, %p787_p3 }
  0x22   : > { %p790_p13 = pnand %p789_p12, %p783_p9 }
  0x24   : > { %793 = shalt.err (!%p790_p13)
}
  0x25   : > { %714 = dma.hbm_to_vmem [thread:$0]  (!%p1002_p6), %s1000_s26, 128, %s1006_s28, %s1010_s4  }
  0x26   : > { %s172_s21 = scalar_lea.vmem [#allocation7], %s1008_s30  ;;  %s1040_s23 = sadd.s32 4294967295, %s926_s15  }
  0x27   : > { %s179_s22 = sshll.u32 %s172_s21, 4  ;;  %s526_s24 = sadd.s32 4294967294, %s926_s15   ;;  %s1066_s22 = int_to_ptr.vmem [resolvable:$true] %s179_s22 }
  0x28   : > { %p40_p3 = scmp.ne.s32.totalorder %s918_s13, %s914_s12  ;;  %p1246_p10 = scmp.eq.s32.totalorder %s1040_s23, 0 }
  0x29   : > { %p111_p1 = scmp.eq.s32.totalorder %s1040_s23, 1  ;;  %p117_p2 = scmp.eq.s32.totalorder %s526_s24, 1 }
  0x2a   : > { %p1049_p4 = por %p1246_p10, %p40_p3  ;;  %p527_p5 = scmp.ge.s32.totalorder %s926_s15, 1 }
  0x2b   : > { %p1057_p7 = por %p111_p1, %p34_p0  ;;  %p1061_p9 = por %p117_p2, %p40_p3 }
  0x2c   : > { %s1251_s25 = scalar_select %p1049_p4, 1, 0 }
  0x2d   : > { %s1252_s26 = scalar_select %p1057_p7, 1, 0 }
  0x2e   : > { %s1253_s27 = scalar_select %p1061_p9, 1, 0 }
  0x2f   : > { %p124_p11 = scmp.lt.s32.totalorder %s926_s15, 3  ;;  %s929_s30 = smov [#allocation5]  }
  0x30   : > { %s136_s5 = sshll.u32 %s929_s30, 4  ;;  %s544_s6 = sshll.u32 %s926_s15, 11  ;;  %s1080_s5 = int_to_ptr.vmem [resolvable:$true] %s136_s5 }
  0x31   : > { %p1068_p12 = pnand %p527_p5, %p124_p11  ;;  %s1078_s9 = scalar_lea.hbm %s1244_s2, %s544_s6 }
  0x32   : > { %s794_s11 = scalar_lea.hbm %s1078_s9, 2048  ;;  %s799_s20 = scalar_lea.hbm %s1244_s2, 4096 }
  0x33   : > { %s1254_s28 = scalar_select %p1068_p12, 1, 0 }
  0x34   : > { %p707_p13 = pneg %p1068_p12  ;;  %p795_p3 = scmp.ne.s32.totalorder %s1078_s9, %s794_s11 }
  0x35   : > { %p800_p5 = scmp.lt.u32.totalorder %s1078_s9, %s1244_s2  ;;  %p801_p11 = scmp.lt.u32.totalorder %s799_s20, %s794_s11 }
  0x36   : > { %p1084_p0 = pnand %p707_p13, %p1246_p10  ;;  %p797_p1 = pnand %p795_p3, %p766_p8 }
  0x37   : > { %p802_p9 = por %p801_p11, %p800_p5  ;;  %p803_p13 = scmp.lt.u32.totalorder %s794_s11, %s1078_s9 }
  0x38   : > { %p798_p2 = pneg %p797_p1 }
  0x39   : > { %p804_p10 = por %p803_p13, %p802_p9 }
  0x3b   : > { %p805_p7 = pnand %p804_p10, %p798_p2 }
  0x3d   : > { %808 = shalt.err (!%p805_p7)
}
  0x3e   : > { %s809_s30 = scalar_lea.vmem %s1066_s22, 2048  ;;  %s930_s6 = smov [#allocation7]  }
  0x3f   : > { %p810_p3 = scmp.ne.s32.totalorder %s1066_s22, %s809_s30  ;;  %s814_s7 = sshll.u32 %s930_s6, 4  ;;  %s815_s7 = int_to_ptr.vmem [resolvable:$false] %s814_s7 }
  0x40   : > { %s816_s8 = scalar_lea.vmem %s815_s7, 4096  ;;  %p817_p12 = scmp.lt.s32.totalorder %s1066_s22, %s815_s7 }
  0x41   : > { %p812_p1 = pnand %p810_p3, %p766_p8  ;;  %p818_p5 = scmp.lt.s32.totalorder %s816_s8, %s809_s30 }
  0x43   : > { %p813_p4 = pneg %p812_p1  ;;  %p819_p11 = por %p818_p5, %p817_p12 }
  0x45   : > { %p820_p9 = pnand %p819_p11, %p813_p4 }
  0x47   : > { %823 = shalt.err (!%p820_p9)
}
  0x48   : > { %s931_s11 = smov 128   ;;  %s932_s17 = smov 8  }
  0x49   : > { %717 = dma.hbm_to_vmem [thread:$0]  (!%p1002_p6), %s1078_s9, 2048, %s1066_s22, %s1010_s4, %s931_s11, %s931_s11, %s932_s17  }
  0x4a   : > { %s824_s21 = scalar_lea.hbm %s1243_s1, 2048  ;;  %p826_p10 = pneg %p1084_p0 }
  0x4b   : > { %p825_p8 = scmp.ne.s32.totalorder %s1243_s1, %s824_s21  ;;  %p831_p12 = scmp.lt.u32.totalorder %s824_s21, %s1243_s1 }
  0x4d   : > { %p827_p4 = pnand %p826_p10, %p825_p8 }
  0x4f   : > { %p828_p7 = pneg %p827_p4 }
  0x51   : > { %p833_p2 = pnand %p831_p12, %p828_p7 }
  0x53   : > { %836 = shalt.err (!%p833_p2)
}
  0x54   : > { %s837_s29 = scalar_lea.vmem %s1080_s5, 2048  ;;  %p845_p1 = scmp.lt.s32.totalorder %s1080_s5, %s1080_s5 }
  0x55   : > { %p838_p6 = scmp.ne.s32.totalorder %s1080_s5, %s837_s29  ;;  %p846_p5 = scmp.lt.s32.totalorder %s837_s29, %s837_s29 }
  0x57   : > { %p840_p13 = pnand %p838_p6, %p826_p10  ;;  %p847_p11 = por %p846_p5, %p845_p1 }
  0x59   : > { %p841_p3 = pneg %p840_p13 }
  0x5b   : > { %p848_p9 = pnand %p847_p11, %p841_p3 }
  0x5d   : > { %851 = shalt.err (!%p848_p9)
}
  0x5e   : > { %710 = dma.hbm_to_vmem [thread:$0]  (!%p1084_p0), %s1243_s1, 2048, %s1080_s5, [#allocation6], %s931_s11, %s931_s11, %s932_s17  }
  0x5f   : > { %p1256_p8 = scmp.ne.s32.totalorder %s1254_s28, 0 }
  0x60   : > { %s193_s9 = sand.u32 (!%p1256_p8), 1, %s1040_s23   ;;  %s1137_s8 = sand.u32 (!%p1256_p8), 1, %s918_s13  }
  0x61   : > { %191 = sbr.rel (%p1256_p8) target bundleno = 583 (0x247), region = 32  ;;  %s536_s18 = sshll.u32 (!%p1256_p8), %s1137_s8, 3 }
  0x62   : > { %s194_s20 = scalar_lea.sflag (!%p1256_p8), [#allocation3], %s193_s9  ;;  %s1142_s10 = scalar_lea.vmem (!%p1256_p8), [#allocation2], %s536_s18 }
  0x63   : > { %p1257_p10 = scmp.ne.s32.totalorder (!%p1256_p8), %s1251_s25, 0 }
  0x68   : > { %897 = dma.done.wait (%p1257_p10), %s194_s20, 128  }
  0x69   : > { %899 = vsyncadd (%p1257_p10), %s194_s20, 4294967168  ;;  %p1258_p0 = scmp.eq.s32.totalorder %s1040_s23, 0 }
  0x6b   : > { %901 = dma.done.wait (%p1258_p0), [#allocation6], 2048   ;;  %p1259_p4 = pmov %p1258_p0 }
  0x6c   : > { %s538_s28 = sshll.u32 %s1137_s8, 7 }
  0x6d   : > { %903 = vsyncadd (%p1259_p4), [#allocation6], 4294965248  ;;  %s1153_s5 = scalar_lea.vmem [#allocation7], %s538_s28 }
  0x6e   : > { %905 = dma.done.wait (%p1257_p10), %s194_s20, 2048  }
  0x6f   : > { %907 = vsyncadd (%p1257_p10), %s194_s20, 4294965248  ;;  %v933_v0 = vmov 0.0|0.0   ;;  %vm934_vm0 = vmmov 0   ;;  %v935_v1 = vmov 0.0   ;;  %v255_v2 = vld [vmem:[#allocation5] sm:$0xff]  ;;  %v256_v3 = vld [vmem:[#allocation5 + $0x8] sm:$0xff] }
  0x70   : > { %649 = vmatprep.subr.bf16.mxu0 %v933_v0  ;;  %611 = vmatprep.mubr.msk.f32.mxu0 %vm934_vm0, %v935_v1  ;;  %v257_v4 = vld [vmem:[#allocation5 + $0x10] sm:$0xff]  ;;  %v650_v5 = vpack.c.bf16 %v256_v3, %v255_v2  ;;  %v258_v6 = vld [vmem:[#allocation5 + $0x18] sm:$0xff]  ;;  %v259_v8 = vld [vmem:[#allocation5 + $0x20] sm:$0xff]  ;;  %s237_s25 = scalar_lea.vmem [#allocation8], %s536_s18  ;;  %s541_s17 = sshll.u32 %s1040_s23, 7 }
  0x71   : > { %673 = vmatprep.subr.bf16.mxu1 %v933_v0  ;;  %646 = vmatprep.mubr.msk.f32.mxu1 %vm934_vm0, %v935_v1  ;;  %v653_v7 = vpack.c.bf16 %v258_v6, %v257_v4  ;;  %v260_v9 = vld [vmem:[#allocation5 + $0x28] sm:$0xff]  ;;  %v239_v10 = vld [vmem:[%s1153_s5] sm:$0xff]  ;;  %v261_v14 = vld [vmem:[#allocation5 + $0x30] sm:$0xff]  ;;  %s426_s11 = sshll.u32 %s237_s25, 4  ;;  %s1200_s6 = scalar_lea.hbm %s1245_s3, %s541_s17  ;;  %s1195_s11 = int_to_ptr.vmem [resolvable:$true] %s426_s11 }
  0x72   : > { %651 = vmatpush3.bf16.msra.mxu0 %v650_v5  ;;  %v240_v11 = vld [vmem:[%s1153_s5 + $0x8] sm:$0xff]  ;;  %v656_v12 = vpack.c.bf16 %v260_v9, %v259_v8  ;;  %v262_v15 = vld [vmem:[#allocation5 + $0x38] sm:$0xff]  ;;  %v241_v16 = vld [vmem:[%s1153_s5 + $0x10] sm:$0xff]  ;;  %s413_s30 = scalar_lea.sflag [#allocation4], %s1137_s8  ;;  %s852_s7 = scalar_lea.vmem %s1195_s11, 128 }
  0x73   : > { %652 = vmatprep.subr.bf16.mxu0 %v933_v0  ;;  %v674_v13 = vpack.c.bf16 %v240_v11, %v239_v10  ;;  %v242_v17 = vld [vmem:[%s1153_s5 + $0x18] sm:$0xff]  ;;  %v659_v18 = vpack.c.bf16 %v262_v15, %v261_v14  ;;  %v263_v19 = vld [vmem:[#allocation5 + $0x40] sm:$0xff]  ;;  %v264_v20 = vld [vmem:[#allocation5 + $0x48] sm:$0xff]  ;;  %p853_p7 = scmp.ne.s32.totalorder %s1195_s11, %s852_s7  ;;  %p1260_p12 = scmp.ne.s32.totalorder %s1252_s26, 0 }
  0x74   : > { %v677_v21 = vpack.c.bf16 %v242_v17, %v241_v16  ;;  %v662_v22 = vpack.c.bf16 %v264_v20, %v263_v19  ;;  %v265_v23 = vld [vmem:[#allocation5 + $0x50] sm:$0xff]  ;;  %v266_v24 = vld [vmem:[#allocation5 + $0x58] sm:$0xff]  ;;  %v243_v25 = vld [vmem:[%s1153_s5 + $0x20] sm:$0xff]  ;;  %s936_s23 = smov [#allocation8]  }
  0x75   : > { %675 = vmatpush3.bf16.xpose.msra.mxu1 %v674_v13  ;;  %v244_v26 = vld [vmem:[%s1153_s5 + $0x28] sm:$0xff]  ;;  %v665_v27 = vpack.c.bf16 %v266_v24, %v265_v23  ;;  %v267_v28 = vld [vmem:[#allocation5 + $0x60] sm:$0xff]  ;;  %v269_v32 = vld [vmem:[#allocation5 + $0x70] sm:$0xff]  ;;  %p854_p2 = pnand %p853_p7, %p1260_p12  ;;  %s856_s29 = sshll.u32 %s936_s23, 4  ;;  %s857_s29 = int_to_ptr.vmem [resolvable:$false] %s856_s29 }
  0x76   : > { %654 = vmatpush3.bf16.msra.mxu0 %v653_v7  ;;  %676 = vmatprep.subr.bf16.mxu1 %v933_v0  ;;  %v268_v29 = vld [vmem:[#allocation5 + $0x68] sm:$0xff]  ;;  %v680_v30 = vpack.c.bf16 %v244_v26, %v243_v25  ;;  %v270_v33 = vld [vmem:[#allocation5 + $0x78] sm:$0xff]  ;;  %v245_v34 = vld [vmem:[%s1153_s5 + $0x30] sm:$0xff]  ;;  %s858_s4 = scalar_lea.vmem %s857_s29, 256  ;;  %p859_p13 = scmp.lt.s32.totalorder %s1195_s11, %s857_s29 }
  0x77   : > { %655 = vmatprep.subr.bf16.mxu0 %v933_v0  ;;  %v668_v31 = vpack.c.bf16 %v268_v29, %v267_v28  ;;  %v246_v35 = vld [vmem:[%s1153_s5 + $0x38] sm:$0xff]  ;;  %v671_v36 = vpack.c.bf16 %v270_v33, %v269_v32  ;;  %v247_v39 = vld [vmem:[%s1153_s5 + $0x40] sm:$0xff]  ;;  %v248_v40 = vld [vmem:[%s1153_s5 + $0x48] sm:$0xff]  ;;  %p855_p6 = pneg %p854_p2  ;;  %p860_p3 = scmp.lt.s32.totalorder %s858_s4, %s852_s7 }
  0x78   : > { %v683_v37 = vpack.c.bf16 %v246_v35, %v245_v34  ;;  %v238_v38 = vld [vmem:[%s1142_s10] sm:$0xff]  ;;  %v686_v41 = vpack.c.bf16 %v248_v40, %v247_v39  ;;  %v251_v45 = vld [vmem:[%s1153_s5 + $0x60] sm:$0xff]  ;;  %v252_v46 = vld [vmem:[%s1153_s5 + $0x68] sm:$0xff] }
  0x79   : > { %v249_v42 = vld [vmem:[%s1153_s5 + $0x50] sm:$0xff]  ;;  %v250_v43 = vld [vmem:[%s1153_s5 + $0x58] sm:$0xff]  ;;  %v692_v47 = vpack.c.bf16 %v252_v46, %v251_v45  ;;  %p861_p1 = por %p860_p3, %p859_p13 }
  0x7a   : > { %657 = vmatpush3.bf16.msra.mxu0 %v656_v12  ;;  %v689_v44 = vpack.c.bf16 %v250_v43, %v249_v42  ;;  %v253_v48 = vld [vmem:[%s1153_s5 + $0x70] sm:$0xff]  ;;  %v254_v49 = vld [vmem:[%s1153_s5 + $0x78] sm:$0xff] }
  0x7b   : > { %658 = vmatprep.subr.bf16.mxu0 %v933_v0  ;;  %v695_v50 = vpack.c.bf16 %v254_v49, %v253_v48  ;;  %p862_p5 = pnand %p861_p1, %p855_p6 }
  0x7d   : > { %678 = vmatpush3.bf16.xpose.msra.mxu1 %v677_v21 }
  0x7e   : > { %660 = vmatpush3.bf16.msra.mxu0 %v659_v18  ;;  %679 = vmatprep.subr.bf16.mxu1 %v933_v0 }
  0x7f   : > { %661 = vmatprep.subr.bf16.mxu0 %v933_v0 }
  0x82   : > { %663 = vmatpush3.bf16.msra.mxu0 %v662_v22 }
  0x83   : > { %664 = vmatprep.subr.bf16.mxu0 %v933_v0 }
  0x85   : > { %681 = vmatpush3.bf16.xpose.msra.mxu1 %v680_v30 }
  0x86   : > { %666 = vmatpush3.bf16.msra.mxu0 %v665_v27  ;;  %682 = vmatprep.subr.bf16.mxu1 %v933_v0 }
  0x87   : > { %667 = vmatprep.subr.bf16.mxu0 %v933_v0 }
  0x8a   : > { %669 = vmatpush3.bf16.msra.mxu0 %v668_v31 }
  0x8b   : > { %670 = vmatprep.subr.bf16.mxu0 %v933_v0 }
  0x8d   : > { %684 = vmatpush3.bf16.xpose.msra.mxu1 %v683_v37 }
  0x8e   : > { %672 = vmatpush3.bf16.msra.mxu0 %v671_v36  ;;  %685 = vmatprep.subr.bf16.mxu1 %v933_v0 }
  0x91   : > { %612 = vmatmul.mubr.f32.vlgmr.msra.gmra.mrb[0].mxu0 %v238_v38 }
  0x95   : > { %687 = vmatpush3.bf16.xpose.msra.mxu1 %v686_v41 }
  0x96   : > { %688 = vmatprep.subr.bf16.mxu1 %v933_v0 }
  0x9d   : > { %690 = vmatpush3.bf16.xpose.msra.mxu1 %v689_v44 }
  0x9e   : > { %691 = vmatprep.subr.bf16.mxu1 %v933_v0 }
  0xa5   : > { %693 = vmatpush3.bf16.xpose.msra.mxu1 %v692_v47 }
  0xa6   : > { %694 = vmatprep.subr.bf16.mxu1 %v933_v0 }
  0xad   : > { %696 = vmatpush3.bf16.xpose.msra.mxu1 %v695_v50 }
 0x164   : > { %v337_v51 = vpop.f32.mrb[0].mxu0 }
 0x165   : > { %v613_v52 = vpop.f32.mrb[1].mxu0  ;;  %647 = vmatmul.mubr.f32.vlgmr.msra.gmra.mrb[0].mxu1 %v337_v51 }
 0x238   : > { %v407_v53 = vpop.f32.mrb[0].mxu1 }
 0x239   : > { %411 = vst [vmem:[%s237_s25] sm:$0xff] %v407_v53  ;;  %v648_v54 = vpop.f32.mrb[1].mxu1 }
 0x23a   : > { %865 = shalt.err (!%p862_p5)
}
 0x23b   : > { %s866_s22 = scalar_lea.hbm %s1200_s6, 128  ;;  %s870_s18 = scalar_lea.hbm %s1245_s3, 256 }
 0x23c   : > { %p867_p11 = scmp.ne.s32.totalorder %s1200_s6, %s866_s22  ;;  %p871_p10 = scmp.lt.u32.totalorder %s1200_s6, %s1245_s3 }
 0x23d   : > { %p872_p0 = scmp.lt.u32.totalorder %s870_s18, %s866_s22  ;;  %p874_p7 = scmp.lt.u32.totalorder %s866_s22, %s1200_s6 }
 0x23e   : > { %p868_p9 = pnand %p867_p11, %p1260_p12 }
 0x23f   : > { %p873_p4 = por %p872_p0, %p871_p10 }
 0x240   : > { %p869_p8 = pneg %p868_p9 }
 0x241   : > { %p875_p2 = por %p874_p7, %p873_p4 }
 0x243   : > { %p876_p6 = pnand %p875_p2, %p869_p8 }
 0x245   : > { %879 = shalt.err (!%p876_p6)
}
 0x246   : > { %705 = dma.vmem_to_hbm [thread:$0]  (%p1260_p12), %s1195_s11, 128, %s1200_s6, %s413_s30  }
 0x247 PF: > { %s438_s28 = sand.u32 1, %s914_s12   ;;  %p1261_p13 = scmp.ne.s32.totalorder %s1253_s27, 0 }
 0x248   : > { %p1262_p3 = scmp.ge.s32.totalorder %s926_s15, 2  ;;  %s439_s5 = scalar_lea.sflag [#allocation4], %s438_s28 }
 0x24a   : > { %p719_p1 = pnand %p1262_p3, %p1261_p13 }
 0x24c   : > { %909 = dma.done.wait (!%p719_p1), %s439_s5, 128  }
 0x24d   : > { %911 = vsyncadd (!%p719_p1), %s439_s5, 4294967168  ;;  %p17_p5 = scmp.ge.s32.totalorder %s978_s16, 4   ;;  %s1263_s12 = smov %s918_s13 }
 0x24e   : > { %s1264_s13 = smov %s922_s14  ;;  %s1265_s14 = smov %s989_s19 }
 0x24f   : > { %s1266_s15 = smov %s978_s16  ;;  %19 = sbr.rel (!%p17_p5) target bundleno = 6 (0x6), region = 92 }
 0x256   :  { %444 = vsyncpa [#allocation3], 1 }
 0x257   :  { %446 = vsyncpa [#allocation3 + $0x1], 1 }
 0x258   :  { %447 = vsyncpa [#allocation6], 1 }
 0x259   :  { %448 = vsyncpa [#allocation4], 1 }
 0x25a   :  { %450 = vsyncpa [#allocation4 + $0x1], 1 }

</bundles_post_ra>
